<compile_context>
chip_gen: v5e
topology: v5e:2x2
jax: 0.10.0
libtpu: 0.0.40
codegen_flags: <defaults>
</compile_context>

<pallas_src>
import functools

import jax
import jax.numpy as jnp
from jax import lax
from jax.experimental import pallas as pl
from jax.experimental.pallas import tpu as pltpu


def _round_up(x, m):
    return ((x + m - 1) // m) * m


def _dnn_kernel(x_ref, w1_ref, b1_ref, w2_ref, b2_ref, w3_ref, b3_ref, o_ref):
    """One batch tile: (TB, 10) -> lane-dense (1, TB) output row."""
    x = x_ref[...]                                              # (TB, 10)

    # Layer 1: (TB, 10) @ (10, 50) + (1, 50) -> ReLU  (f32 accumulate)
    h1 = jnp.dot(x, w1_ref[...], preferred_element_type=jnp.float32)
    h1 = jnp.maximum(h1 + b1_ref[...], 0.0)                     # (TB, 50) f32

    # Layer 2: (TB, 50) @ (50, 30) + (1, 30) -> ReLU
    h2 = jnp.dot(h1.astype(w2_ref.dtype), w2_ref[...],
                 preferred_element_type=jnp.float32)
    h2 = jnp.maximum(h2 + b2_ref[...], 0.0)                     # (TB, 30) f32

    # Layer 3 (lane-dense): contract (1, 30) with (TB, 30) on the feature dim
    # -> (1, TB); add the scalar bias in-kernel (broadcast from (1, 1)).
    h3 = lax.dot_general(w3_ref[...], h2.astype(w3_ref.dtype),
                         dimension_numbers=(((1,), (1,)), ((), ())),
                         preferred_element_type=jnp.float32)    # (1, TB)

    o_ref[...] = (h3 + b3_ref[...]).astype(o_ref.dtype)         # (1, TB)


@functools.partial(jax.jit, static_argnames=("block_b", "compute_dtype"))
def dnn_forward(x, params, *, block_b=512, compute_dtype=jnp.float32):
    """x: (B, 10) float32.  params: w1 (10,50), b1 (1,50), w2 (50,30), b2 (1,30),
    w3 (1,30) [PyTorch (out,in) layout], b3 (1,)."""
    B, F = x.shape
    assert F == 10, F
    w1, b1 = params["w1"], params["b1"]
    w2, b2 = params["w2"], params["b2"]
    w3, b3 = params["w3"], params["b3"]

    # Batch tile: multiple of 128 so the (1, TB) output tile is lane-dense;
    # clamp for tiny batches so we do not overpad the last (only) tile.
    tb = max(128, _round_up(min(block_b, B), 128))
    num_tiles = pl.cdiv(B, tb)

    cd = compute_dtype
    x_c = x.astype(cd)
    w1c, w2c, w3c = w1.astype(cd), w2.astype(cd), w3.astype(cd)
    b1f = b1.astype(jnp.float32)                 # biases stay f32
    b2f = b2.astype(jnp.float32)
    b3f = b3.reshape(1, 1).astype(jnp.float32)

    # Weights/biases: full-array blocks, constant index_map -> fetched once,
    # VMEM resident across all grid steps.
    const = lambda a: pl.BlockSpec(a.shape, lambda i: (0,) * a.ndim)

    out = pl.pallas_call(
        _dnn_kernel,
        out_shape=jax.ShapeDtypeStruct((1, B), jnp.float32),
        grid=(num_tiles,),
        in_specs=[
            pl.BlockSpec((tb, F), lambda i: (i, 0)),    # x: streamed per tile
            const(w1c), const(b1f),
            const(w2c), const(b2f),
            const(w3c), const(b3f),
        ],
        out_specs=pl.BlockSpec((1, tb), lambda i: (0, i)),
        compiler_params=pltpu.CompilerParams(
            dimension_semantics=("parallel",),   # megacore split on v7x
            vmem_limit_bytes=32 << 20,           # working set is tiny
        ),
    )(x_c, w1c, b1f, w2c, b2f, w3c, b3f)

    # (1, B) row-major == (B, 1) row-major -> free reshape.
    return out.reshape(B, 1)


def init_params(key):
    """Deterministic init mirroring nn.Linear shapes.  w1/w2 stored (in, out),
    w3 stored (out, in) = (1, 30) for the lane-dense final dot."""
    ks = jax.random.split(key, 6)

    def linear(kw, kb, fan_in, w_shape, b_shape):
        bound = 1.0 / (fan_in ** 0.5)
        w = jax.random.uniform(kw, w_shape, jnp.float32, -bound, bound)
        b = jax.random.uniform(kb, b_shape, jnp.float32, -bound, bound)
        return w, b

    w1, b1 = linear(ks[0], ks[1], 10, (10, 50), (1, 50))
    w2, b2 = linear(ks[2], ks[3], 50, (50, 30), (1, 30))
    w3, b3 = linear(ks[4], ks[5], 30, (1, 30), (1,))
    return {"w1": w1, "b1": b1, "w2": w2, "b2": b2, "w3": w3, "b3": b3}


def dnn_reference(x, p):
    h = jnp.maximum(x @ p["w1"] + p["b1"], 0.0)
    h = jnp.maximum(h @ p["w2"] + p["b2"], 0.0)
    return h @ p["w3"].T + p["b3"]


if __name__ == "__main__":
    key = jax.random.PRNGKey(0)
    kx, kp = jax.random.split(key)
    params = init_params(kp)

    # Small batch (matches the module's toy usage): single partial grid tile.
    batch = 8
    x = jax.random.normal(kx, (batch, 10), jnp.float32)
    out = jax.block_until_ready(dnn_forward(x, params))
    ref = dnn_reference(x, params)
    assert out.shape == (batch, 1), out.shape
    assert jnp.allclose(out, ref, atol=1e-5, rtol=1e-5)

    # Larger non-divisible batch: multi-tile grid + ragged last tile.
    xb = jax.random.normal(kx, (1000, 10), jnp.float32)
    outb = jax.block_until_ready(dnn_forward(xb, params, block_b=512))
    refb = dnn_reference(xb, params)
    assert outb.shape == (1000, 1), outb.shape
    assert jnp.allclose(outb, refb, atol=1e-4, rtol=1e-4)

    # bf16 compute path (halved HBM traffic for large B); f32 accumulation.
    outbf = jax.block_until_ready(
        dnn_forward(xb, params, block_b=512, compute_dtype=jnp.bfloat16))
    assert outbf.shape == (1000, 1), outbf.shape
    assert jnp.allclose(outbf, refb, atol=1e-1, rtol=1e-1)

    print("KERNEL_OK")
</pallas_src>

<mosaic_0001>
module attributes {stable_mosaic.version = 11 : i64} {
  func.func @_dnn_kernel(%arg0: i32, %arg1: memref<128x10xf32, #tpu.memory_space<vmem>>, %arg2: memref<10x50xf32, #tpu.memory_space<vmem>>, %arg3: memref<1x50xf32, #tpu.memory_space<vmem>>, %arg4: memref<50x30xf32, #tpu.memory_space<vmem>>, %arg5: memref<1x30xf32, #tpu.memory_space<vmem>>, %arg6: memref<1x30xf32, #tpu.memory_space<vmem>>, %arg7: memref<1x1xf32, #tpu.memory_space<vmem>>, %arg8: memref<1x128xf32, #tpu.memory_space<vmem>>) attributes {dimension_semantics = [#tpu.dimension_semantics<parallel>], iteration_bounds = array<i64: 1>, scalar_prefetch = 0 : i64, scratch_operands = 0 : i64, tpu.core_type = #tpu.core_type<tc>, window_params = [{transform_indices = @transform_0, window_bounds = array<i64: 128, 10>}, {pipeline_mode = #tpu.pipeline_mode<synchronous>, transform_indices = @transform_1, window_bounds = array<i64: 10, 50>}, {pipeline_mode = #tpu.pipeline_mode<synchronous>, transform_indices = @transform_2, window_bounds = array<i64: 1, 50>}, {pipeline_mode = #tpu.pipeline_mode<synchronous>, transform_indices = @transform_3, window_bounds = array<i64: 50, 30>}, {pipeline_mode = #tpu.pipeline_mode<synchronous>, transform_indices = @transform_4, window_bounds = array<i64: 1, 30>}, {pipeline_mode = #tpu.pipeline_mode<synchronous>, transform_indices = @transform_5, window_bounds = array<i64: 1, 30>}, {pipeline_mode = #tpu.pipeline_mode<synchronous>, transform_indices = @transform_6, window_bounds = array<i64: 1, 1>}, {transform_indices = @transform_7, window_bounds = array<i64: 1, 128>}]} {
    %c0 = arith.constant 0 : index
    %c0_0 = arith.constant 0 : index
    %0 = vector.load %arg1[%c0, %c0_0] : memref<128x10xf32, #tpu.memory_space<vmem>>, vector<128x10xf32>
    %c0_1 = arith.constant 0 : index
    %c0_2 = arith.constant 0 : index
    %1 = vector.load %arg2[%c0_1, %c0_2] : memref<10x50xf32, #tpu.memory_space<vmem>>, vector<10x50xf32>
    %cst = arith.constant dense<0.000000e+00> : vector<128x50xf32>
    %2 = tpu.matmul %0, %1, %cst {dimension_numbers = #tpu.dot_dimension_numbers<[1], [0], [0], [1], [0, 0, 1, 1], [], []>} : vector<128x10xf32>, vector<10x50xf32>, vector<128x50xf32> -> vector<128x50xf32>
    %c0_3 = arith.constant 0 : index
    %c0_4 = arith.constant 0 : index
    %3 = vector.load %arg3[%c0_3, %c0_4] : memref<1x50xf32, #tpu.memory_space<vmem>>, vector<1x50xf32>
    %4 = vector.broadcast %3 : vector<1x50xf32> to vector<128x50xf32>
    %5 = arith.addf %2, %4 : vector<128x50xf32>
    %cst_5 = arith.constant 0.000000e+00 : f32
    %6 = vector.broadcast %cst_5 : f32 to vector<128x50xf32>
    %7 = arith.maximumf %5, %6 : vector<128x50xf32>
    %c0_6 = arith.constant 0 : index
    %c0_7 = arith.constant 0 : index
    %8 = vector.load %arg4[%c0_6, %c0_7] : memref<50x30xf32, #tpu.memory_space<vmem>>, vector<50x30xf32>
    %cst_8 = arith.constant dense<0.000000e+00> : vector<128x30xf32>
    %9 = tpu.matmul %7, %8, %cst_8 {dimension_numbers = #tpu.dot_dimension_numbers<[1], [0], [0], [1], [0, 0, 1, 1], [], []>} : vector<128x50xf32>, vector<50x30xf32>, vector<128x30xf32> -> vector<128x30xf32>
    %c0_9 = arith.constant 0 : index
    %c0_10 = arith.constant 0 : index
    %10 = vector.load %arg5[%c0_9, %c0_10] : memref<1x30xf32, #tpu.memory_space<vmem>>, vector<1x30xf32>
    %11 = vector.broadcast %10 : vector<1x30xf32> to vector<128x30xf32>
    %12 = arith.addf %9, %11 : vector<128x30xf32>
    %cst_11 = arith.constant 0.000000e+00 : f32
    %13 = vector.broadcast %cst_11 : f32 to vector<128x30xf32>
    %14 = arith.maximumf %12, %13 : vector<128x30xf32>
    %c0_12 = arith.constant 0 : index
    %c0_13 = arith.constant 0 : index
    %15 = vector.load %arg6[%c0_12, %c0_13] : memref<1x30xf32, #tpu.memory_space<vmem>>, vector<1x30xf32>
    %cst_14 = arith.constant dense<0.000000e+00> : vector<1x128xf32>
    %16 = tpu.matmul %15, %14, %cst_14 {dimension_numbers = #tpu.dot_dimension_numbers<[1], [1], [0], [0], [0, 0, 1, 0], [], []>} : vector<1x30xf32>, vector<128x30xf32>, vector<1x128xf32> -> vector<1x128xf32>
    %c0_15 = arith.constant 0 : index
    %c0_16 = arith.constant 0 : index
    %17 = vector.load %arg7[%c0_15, %c0_16] : memref<1x1xf32, #tpu.memory_space<vmem>>, vector<1x1xf32>
    %18 = vector.broadcast %17 : vector<1x1xf32> to vector<1x128xf32>
    %19 = arith.addf %16, %18 : vector<1x128xf32>
    %c0_17 = arith.constant 0 : index
    %c0_18 = arith.constant 0 : index
    %20 = vector.load %arg8[%c0_17, %c0_18] : memref<1x128xf32, #tpu.memory_space<vmem>>, vector<1x128xf32>
    tpu.vector_store %arg8[%c0_17, %c0_18], %19 {strides = array<i32>} : memref<1x128xf32, #tpu.memory_space<vmem>>, vector<1x128xf32>,
    return
  }
  func.func @transform_0(%arg0: i32) -> (i32, i32) {
    %c0_i32 = arith.constant 0 : i32
    %c0_i32_0 = arith.constant 0 : i32
    return %arg0, %c0_i32 : i32, i32
  }
  func.func @transform_1(%arg0: i32) -> (i32, i32) {
    %c0_i32 = arith.constant 0 : i32
    %c0_i32_0 = arith.constant 0 : i32
    %c0_i32_1 = arith.constant 0 : i32
    return %c0_i32, %c0_i32_0 : i32, i32
  }
  func.func @transform_2(%arg0: i32) -> (i32, i32) {
    %c0_i32 = arith.constant 0 : i32
    %c0_i32_0 = arith.constant 0 : i32
    %c0_i32_1 = arith.constant 0 : i32
    return %c0_i32, %c0_i32_0 : i32, i32
  }
  func.func @transform_3(%arg0: i32) -> (i32, i32) {
    %c0_i32 = arith.constant 0 : i32
    %c0_i32_0 = arith.constant 0 : i32
    %c0_i32_1 = arith.constant 0 : i32
    return %c0_i32, %c0_i32_0 : i32, i32
  }
  func.func @transform_4(%arg0: i32) -> (i32, i32) {
    %c0_i32 = arith.constant 0 : i32
    %c0_i32_0 = arith.constant 0 : i32
    %c0_i32_1 = arith.constant 0 : i32
    return %c0_i32, %c0_i32_0 : i32, i32
  }
  func.func @transform_5(%arg0: i32) -> (i32, i32) {
    %c0_i32 = arith.constant 0 : i32
    %c0_i32_0 = arith.constant 0 : i32
    %c0_i32_1 = arith.constant 0 : i32
    return %c0_i32, %c0_i32_0 : i32, i32
  }
  func.func @transform_6(%arg0: i32) -> (i32, i32) {
    %c0_i32 = arith.constant 0 : i32
    %c0_i32_0 = arith.constant 0 : i32
    %c0_i32_1 = arith.constant 0 : i32
    return %c0_i32, %c0_i32_0 : i32, i32
  }
  func.func @transform_7(%arg0: i32) -> (i32, i32) {
    %c0_i32 = arith.constant 0 : i32
    %c0_i32_0 = arith.constant 0 : i32
    return %c0_i32, %arg0 : i32, i32
  }
}

</mosaic_0001>

<bundles_post_ra>
// kernel: dnn_forward.1
= control target key start
LH: loop header
LB: loop body
LE: loop exit
PB: predicated region body
PF: predicated region fallthrough
CT: control target
= control target key end

     0   :  { %s723_s0 = inlined_call_operand.vmem [shape: f32[8,10], index: 0, kind: input, shape index: {}]   ;;  %s724_s1 = inlined_call_operand.vmem [shape: f32[10,50], index: 1, kind: input, shape index: {}]   ;;  %s725_s2 = inlined_call_operand.vmem [shape: f32[1,50], index: 2, kind: input, shape index: {}]   ;;  %s726_s3 = inlined_call_operand.vmem [shape: f32[50,30], index: 3, kind: input, shape index: {}]   ;;  %s727_s4 = inlined_call_operand.vmem [shape: f32[1,30], index: 4, kind: input, shape index: {}]   ;;  %s728_s5 = inlined_call_operand.vmem [shape: f32[1,30], index: 5, kind: input, shape index: {}]   ;;  %s729_s6 = inlined_call_operand.<no memory space> [shape: f32[1,1], index: 6, kind: input, shape index: {}]   ;;  %s730_s7 = inlined_call_operand.hbm [shape: f32[1,8], index: 7, kind: output, shape index: {}]  }
   0x1   :  { %v12_v0 = vstv %s729_s6 }
   0x2   :  { %13 = vst [vmem:[#allocation2] sm:$0x1] %v12_v0 }
   0x3   :  { %v46_v1 = vld [vmem:[%s724_s1 + $0x8] sm:$0x3]  ;;  %vm100_vm0 = vcmask 1041408   ;;  %v45_v2 = vld [vmem:[%s724_s1] sm:$0xff]  ;;  %vm51_vm1 = vcmask 80896  }
   0x4   :  { %426 = vmatpush.msk.msra.mxu0 %vm100_vm0, %v46_v1  ;;  %v29_v3 = vld [vmem:[%s723_s0] sm:$0xff]  ;;  %477 = vmatpush.msk.msra.mxu3 %vm100_vm0, %v46_v1 }
   0x6   :  { %119 = vmatpush.msra.mxu0 %v45_v2  ;;  %478 = vmatpush.msra.mxu3 %v45_v2 }
   0x7   :  { %14 = vsyncpa [#allocation4], 0  ;;  %427 = vmatmul.msk.f32.vlgmr.msra.gmra.mxu0 %vm51_vm1, %v29_v3  ;;  %v30_v4 = vld [vmem:[%s723_s0 + $0x8] sm:$0xff]  ;;  %v31_v5 = vld [vmem:[%s723_s0 + $0x10] sm:$0xff]  ;;  %vm196_vm2 = vcmask 408576   ;;  %vm337_vm3 = vcmask 244736  }
   0x8   :  { %v32_v6 = vld [vmem:[%s723_s0 + $0x18] sm:$0xff]  ;;  %v33_v7 = vld [vmem:[%s723_s0 + $0x20] sm:$0xff]  ;;  %v34_v8 = vld [vmem:[%s723_s0 + $0x28] sm:$0xff]  ;;  %s518_s28 = smov [#allocation3]   ;;  %s417_s6 = sshll.u32 %s730_s7, 4  ;;  %s418_s6 = int_to_ptr.hbm [resolvable:$true] %s417_s6 }
   0x9   :  { %v35_v9 = vld [vmem:[%s723_s0 + $0x30] sm:$0xff]  ;;  %v40_v10 = vld [vmem:[%s723_s0 + $0x58] sm:$0xff]  ;;  %v190_v12 = vld [vmem:[%s726_s3 + $0x28] sm:$0xff]  ;;  %s415_s29 = sshll.u32 %s518_s28, 4  ;;  %s416_s29 = int_to_ptr.vmem [resolvable:$true] %s415_s29 }
   0xa   :  { %438 = vmatmul.msk.f32.vlgmr.msra.gmra.mxu3 %vm51_vm1, %v40_v10  ;;  %v191_v11 = vld [vmem:[%s726_s3 + $0x30] sm:$0x3]  ;;  %v189_v13 = vld [vmem:[%s726_s3 + $0x20] sm:$0xff]  ;;  %v36_v14 = vld [vmem:[%s723_s0 + $0x38] sm:$0xff] }
   0xb   :  { %443 = vmatpush.msk.msra.mxu1 %vm100_vm0, %v191_v11  ;;  %479 = vmatpush.msk.msrb.mxu3 %vm100_vm0, %v191_v11  ;;  %v188_v15 = vld [vmem:[%s726_s3 + $0x18] sm:$0xff]  ;;  %v41_v16 = vld [vmem:[%s723_s0 + $0x60] sm:$0xff]  ;;  %v42_v18 = vld [vmem:[%s723_s0 + $0x68] sm:$0xff] }
   0xc   :  { %v37_v17 = vld [vmem:[%s723_s0 + $0x40] sm:$0xff]  ;;  %v38_v19 = vld [vmem:[%s723_s0 + $0x48] sm:$0xff]  ;;  %v43_v20 = vld [vmem:[%s723_s0 + $0x70] sm:$0xff] }
   0xd   :  { %258 = vmatpush.msra.mxu1 %v190_v12  ;;  %480 = vmatpush.msrb.mxu3 %v190_v12  ;;  %v39_v21 = vld [vmem:[%s723_s0 + $0x50] sm:$0xff]  ;;  %v44_v22 = vld [vmem:[%s723_s0 + $0x78] sm:$0xff]  ;;  %v186_v24 = vld [vmem:[%s726_s3 + $0x8] sm:$0xff] }
   0xe   :  { %v187_v23 = vld [vmem:[%s726_s3 + $0x10] sm:$0xff]  ;;  %v185_v25 = vld [vmem:[%s726_s3] sm:$0xff] }
   0xf   :  { %428 = vmatmul.msk.f32.gmra.mxu0 %vm51_vm1, %v30_v4  ;;  %259 = vmatpush.msra.mxu1 %v189_v13  ;;  %v660_v26 = vld [vmem:[%s725_s2] ss:$0 sm:$0xff] }
  0x10   :  { %481 = vmatpush.msrb.mxu3 %v189_v13 }
  0x11   :  { %260 = vmatpush.msra.mxu1 %v188_v15 }
  0x12   :  { %439 = vmatmul.msk.f32.gmra.mxu3 %vm51_vm1, %v41_v16 }
  0x13   :  { %482 = vmatpush.msrb.mxu3 %v188_v15  ;;  %261 = vmatpush.msra.mxu1 %v187_v23 }
  0x15   :  { %483 = vmatpush.msrb.mxu3 %v187_v23  ;;  %262 = vmatpush.msra.mxu1 %v186_v24  ;;  %v490_v23 = vld [vmem:[%s727_s4] ss:$0 sm:$0xff] }
  0x17   :  { %429 = vmatmul.msk.f32.gmra.mxu0 %vm51_vm1, %v31_v5  ;;  %484 = vmatpush.msrb.mxu3 %v186_v24 }
  0x18   :  { %263 = vmatpush.msra.mxu1 %v185_v25 }
  0x19   :  { %485 = vmatpush.msrb.mxu3 %v185_v25 }
  0x1a   :  { %440 = vmatmul.msk.f32.gmra.mxu3 %vm51_vm1, %v42_v18 }
  0x1f   :  { %430 = vmatmul.msk.f32.gmra.mxu0 %vm51_vm1, %v32_v6 }
  0x22   :  { %441 = vmatmul.msk.f32.gmra.mxu3 %vm51_vm1, %v43_v20 }
  0x27   :  { %431 = vmatmul.msk.f32.gmra.mxu0 %vm51_vm1, %v33_v7 }
  0x2a   :  { %442 = vmatmul.msk.f32.gmra.mxu3 %vm51_vm1, %v44_v22 }
  0x2f   :  { %432 = vmatmul.msk.f32.gmra.mxu0 %vm51_vm1, %v34_v8 }
  0x37   :  { %433 = vmatmul.msk.f32.gmra.mxu0 %vm51_vm1, %v35_v9 }
  0x3f   :  { %434 = vmatmul.msk.f32.gmra.mxu0 %vm51_vm1, %v36_v14 }
  0x47   :  { %435 = vmatmul.msk.f32.gmra.mxu0 %vm51_vm1, %v37_v17 }
  0x4f   :  { %436 = vmatmul.msk.f32.gmra.mxu0 %vm51_vm1, %v38_v19 }
  0x57   :  { %437 = vmatmul.msk.f32.gmra.mxu0 %vm51_vm1, %v39_v21 }
  0x84   :  { %v121_v27 = vpop.f32.mrf.mxu0 }
  0x85   :  { %v122_v28 = vadd.f32 %v660_v26, %v121_v27 }
  0x87   :  { %v169_v29 = vmax.f32 %v122_v28, 0.0 }
  0x89   :  { %444 = vmatmul.msk.f32.vlgmr.msra.gmra.mxu1 %vm196_vm2, %v169_v29 }
  0x8c   :  { %v124_v30 = vpop.f32.mrf.mxu0 }
  0x8d   :  { %v125_v31 = vadd.f32 %v660_v26, %v124_v30  ;;  %v154_v56 = vpop.f32.mrf.mxu3 }
  0x8e   :  { %v155_v62 = vadd.f32 %v660_v26, %v154_v56 }
  0x8f   :  { %v170_v32 = vmax.f32 %v125_v31, 0.0 }
  0x90   :  { %v180_v63 = vmax.f32 %v155_v62, 0.0  ;;  %v329_v62 = vld [vmem:[%s728_s5] sm:$0x1] }
  0x91   :  { %445 = vmatmul.msk.f32.gmra.mxu1 %vm196_vm2, %v170_v32 }
  0x94   :  { %v127_v33 = vpop.f32.mrf.mxu0 }
  0x95   :  { %v128_v34 = vadd.f32 %v660_v26, %v127_v33  ;;  %v157_v61 = vpop.f32.mrf.mxu3 }
  0x96   :  { %v158_v0 = vadd.f32 %v660_v26, %v157_v61 }
  0x97   :  { %v171_v35 = vmax.f32 %v128_v34, 0.0 }
  0x98   :  { %v181_v2 = vmax.f32 %v158_v0, 0.0 }
  0x99   :  { %446 = vmatmul.msk.f32.gmra.mxu1 %vm196_vm2, %v171_v35 }
  0x9c   :  { %v130_v36 = vpop.f32.mrf.mxu0 }
  0x9d   :  { %v131_v37 = vadd.f32 %v660_v26, %v130_v36  ;;  %v160_v1 = vpop.f32.mrf.mxu3 }
  0x9e   :  { %v161_v3 = vadd.f32 %v660_v26, %v160_v1 }
  0x9f   :  { %v172_v38 = vmax.f32 %v131_v37, 0.0 }
  0xa0   :  { %v182_v5 = vmax.f32 %v161_v3, 0.0 }
  0xa1   :  { %447 = vmatmul.msk.f32.gmra.mxu1 %vm196_vm2, %v172_v38 }
  0xa4   :  { %v133_v39 = vpop.f32.mrf.mxu0 }
  0xa5   :  { %v134_v40 = vadd.f32 %v660_v26, %v133_v39  ;;  %v163_v4 = vpop.f32.mrf.mxu3 }
  0xa6   :  { %v164_v6 = vadd.f32 %v660_v26, %v163_v4 }
  0xa7   :  { %v173_v41 = vmax.f32 %v134_v40, 0.0 }
  0xa8   :  { %v183_v7 = vmax.f32 %v164_v6, 0.0 }
  0xa9   :  { %448 = vmatmul.msk.f32.gmra.mxu1 %vm196_vm2, %v173_v41 }
  0xac   :  { %v136_v42 = vpop.f32.mrf.mxu0 }
  0xad   :  { %v137_v43 = vadd.f32 %v660_v26, %v136_v42  ;;  %v166_v8 = vpop.f32.mrf.mxu3 }
  0xae   :  { %v167_v9 = vadd.f32 %v660_v26, %v166_v8 }
  0xaf   :  { %v174_v44 = vmax.f32 %v137_v43, 0.0 }
  0xb0   :  { %v184_v10 = vmax.f32 %v167_v9, 0.0 }
  0xb1   :  { %449 = vmatmul.msk.f32.gmra.mxu1 %vm196_vm2, %v174_v44 }
  0xb4   :  { %v139_v45 = vpop.f32.mrf.mxu0 }
  0xb5   :  { %v140_v46 = vadd.f32 %v660_v26, %v139_v45 }
  0xb7   :  { %v175_v47 = vmax.f32 %v140_v46, 0.0 }
  0xb9   :  { %450 = vmatmul.msk.f32.gmra.mxu1 %vm196_vm2, %v175_v47  ;;  %v330_v47 = vld [vmem:[#allocation2] sm:$0x1] }
  0xbc   :  { %v142_v48 = vpop.f32.mrf.mxu0 }
  0xbd   :  { %v143_v49 = vadd.f32 %v660_v26, %v142_v48  ;;  %v517_v48 = vmov 0  }
  0xbe   :  { %488 = vset.pattern.permute.xlu0 %v517_v48 }
  0xbf   :  { %v176_v50 = vmax.f32 %v143_v49, 0.0  ;;  %333 = vperm.xlu0 %488, %v330_v47  }
  0xc1   :  { %451 = vmatmul.msk.f32.gmra.mxu1 %vm196_vm2, %v176_v50 }
  0xc4   :  { %v145_v51 = vpop.f32.mrf.mxu0 }
  0xc5   :  { %v146_v52 = vadd.f32 %v660_v26, %v145_v51 }
  0xc7   :  { %v177_v53 = vmax.f32 %v146_v52, 0.0 }
  0xc9   :  { %452 = vmatmul.msk.f32.gmra.mxu1 %vm196_vm2, %v177_v53 }
  0xcc   :  { %v148_v54 = vpop.f32.mrf.mxu0 }
  0xcd   :  { %v149_v55 = vadd.f32 %v660_v26, %v148_v54 }
  0xcf   :  { %v178_v57 = vmax.f32 %v149_v55, 0.0 }
  0xd1   :  { %453 = vmatmul.msk.f32.gmra.mxu1 %vm196_vm2, %v178_v57 }
  0xd4   :  { %v151_v58 = vpop.f32.mrf.mxu0 }
  0xd5   :  { %v152_v59 = vadd.f32 %v660_v26, %v151_v58 }
  0xd7   :  { %v179_v60 = vmax.f32 %v152_v59, 0.0 }
  0xd9   :  { %454 = vmatmul.msk.f32.vlgmr.msrb.gmra.mxu3 %vm196_vm2, %v179_v60 }
  0xe1   :  { %455 = vmatmul.msk.f32.gmra.mxu3 %vm196_vm2, %v180_v63 }
  0xe9   :  { %456 = vmatmul.msk.f32.gmra.mxu3 %vm196_vm2, %v181_v2 }
  0xf1   :  { %457 = vmatmul.msk.f32.gmra.mxu3 %vm196_vm2, %v182_v5 }
  0xf9   :  { %458 = vmatmul.msk.f32.gmra.mxu3 %vm196_vm2, %v183_v7 }
 0x101   :  { %459 = vmatmul.msk.f32.gmra.mxu3 %vm196_vm2, %v184_v10 }
 0x106   :  { %v694_v11 = vpop.f32.mrf.mxu1 }
 0x107   :  { %v266_v59 = vadd.f32 %v490_v23, %v694_v11 }
 0x109   :  { %v313_v61 = vmax.f32 %v266_v59, 0.0 }
 0x10e   :  { %v268_v12 = vpop.f32.mrf.mxu1 }
 0x10f   :  { %v269_v57 = vadd.f32 %v490_v23, %v268_v12 }
 0x111   :  { %v314_v60 = vmax.f32 %v269_v57, 0.0 }
 0x116   :  { %v271_v13 = vpop.f32.mrf.mxu1 }
 0x117   :  { %v272_v55 = vadd.f32 %v490_v23, %v271_v13 }
 0x119   :  { %v315_v58 = vmax.f32 %v272_v55, 0.0 }
 0x11e   :  { %v274_v14 = vpop.f32.mrf.mxu1 }
 0x11f   :  { %v275_v53 = vadd.f32 %v490_v23, %v274_v14 }
 0x121   :  { %v316_v56 = vmax.f32 %v275_v53, 0.0 }
 0x126   :  { %v277_v17 = vpop.f32.mrf.mxu1 }
 0x127   :  { %v278_v51 = vadd.f32 %v490_v23, %v277_v17 }
 0x129   :  { %v317_v54 = vmax.f32 %v278_v51, 0.0 }
 0x12e   :  { %v280_v19 = vpop.f32.mrf.mxu1 }
 0x12f   :  { %v281_v49 = vadd.f32 %v490_v23, %v280_v19 }
 0x131   :  { %v318_v52 = vmax.f32 %v281_v49, 0.0  ;;  %v334_v63 = vpop.permute.xlu0 %333 }
 0x132   :  { %v336_v0 = vperm.slane %v334_v63, 0 }
 0x136   :  { %v283_v21 = vpop.f32.mrf.mxu1 }
 0x137   :  { %v284_v45 = vadd.f32 %v490_v23, %v283_v21 }
 0x139   :  { %v319_v50 = vmax.f32 %v284_v45, 0.0 }
 0x13e   :  { %v286_v24 = vpop.f32.mrf.mxu1 }
 0x13f   :  { %v287_v43 = vadd.f32 %v490_v23, %v286_v24 }
 0x141   :  { %v320_v46 = vmax.f32 %v287_v43, 0.0 }
 0x146   :  { %v289_v31 = vpop.f32.mrf.mxu1 }
 0x147   :  { %v290_v41 = vadd.f32 %v490_v23, %v289_v31 }
 0x149   :  { %v321_v44 = vmax.f32 %v290_v41, 0.0 }
 0x14e   :  { %v292_v38 = vpop.f32.mrf.mxu1 }
 0x14f   :  { %v293_v39 = vadd.f32 %v490_v23, %v292_v38 }
 0x151   :  { %v322_v42 = vmax.f32 %v293_v39, 0.0 }
 0x15c   :  { %v295_v15 = vpop.f32.mrf.mxu3 }
 0x15d   :  { %v296_v36 = vadd.f32 %v490_v23, %v295_v15 }
 0x15f   :  { %v323_v40 = vmax.f32 %v296_v36, 0.0 }
 0x164   :  { %v298_v16 = vpop.f32.mrf.mxu3 }
 0x165   :  { %v299_v34 = vadd.f32 %v490_v23, %v298_v16 }
 0x167   :  { %v324_v37 = vmax.f32 %v299_v34, 0.0 }
 0x16c   :  { %v301_v18 = vpop.f32.mrf.mxu3 }
 0x16d   :  { %v302_v32 = vadd.f32 %v490_v23, %v301_v18 }
 0x16f   :  { %v325_v35 = vmax.f32 %v302_v32, 0.0 }
 0x174   :  { %v304_v20 = vpop.f32.mrf.mxu3 }
 0x175   :  { %v305_v29 = vadd.f32 %v490_v23, %v304_v20 }
 0x177   :  { %v326_v33 = vmax.f32 %v305_v29, 0.0 }
 0x17c   :  { %v307_v22 = vpop.f32.mrf.mxu3 }
 0x17d   :  { %v308_v27 = vadd.f32 %v490_v23, %v307_v22 }
 0x17f   :  { %v327_v30 = vmax.f32 %v308_v27, 0.0 }
 0x184   :  { %v310_v25 = vpop.f32.mrf.mxu3 }
 0x185   :  { %v311_v26 = vadd.f32 %v490_v23, %v310_v25 }
 0x187   :  { %v328_v28 = vmax.f32 %v311_v26, 0.0 }
 0x189   :  { %460 = vmatpush.xpose.msk.msra.mxu2 %vm337_vm3, %v328_v28 }
 0x18d   :  { %461 = vmatpush.xpose.msk.msra.mxu2 %vm337_vm3, %v327_v30 }
 0x191   :  { %462 = vmatpush.xpose.msk.msra.mxu2 %vm337_vm3, %v326_v33 }
 0x195   :  { %463 = vmatpush.xpose.msk.msra.mxu2 %vm337_vm3, %v325_v35 }
 0x199   :  { %464 = vmatpush.xpose.msk.msra.mxu2 %vm337_vm3, %v324_v37 }
 0x19d   :  { %465 = vmatpush.xpose.msk.msra.mxu2 %vm337_vm3, %v323_v40 }
 0x1a1   :  { %466 = vmatpush.xpose.msk.msra.mxu2 %vm337_vm3, %v322_v42 }
 0x1a5   :  { %467 = vmatpush.xpose.msk.msra.mxu2 %vm337_vm3, %v321_v44 }
 0x1a9   :  { %468 = vmatpush.xpose.msk.msra.mxu2 %vm337_vm3, %v320_v46 }
 0x1ad   :  { %469 = vmatpush.xpose.msk.msra.mxu2 %vm337_vm3, %v319_v50 }
 0x1b1   :  { %470 = vmatpush.xpose.msk.msra.mxu2 %vm337_vm3, %v318_v52 }
 0x1b5   :  { %471 = vmatpush.xpose.msk.msra.mxu2 %vm337_vm3, %v317_v54 }
 0x1b9   :  { %472 = vmatpush.xpose.msk.msra.mxu2 %vm337_vm3, %v316_v56 }
 0x1bd   :  { %473 = vmatpush.xpose.msk.msra.mxu2 %vm337_vm3, %v315_v58 }
 0x1c1   :  { %474 = vmatpush.xpose.msk.msra.mxu2 %vm337_vm3, %v314_v60 }
 0x1c5   :  { %475 = vmatpush.xpose.msk.msra.mxu2 %vm337_vm3, %v313_v61 }
 0x1c8   :  { %476 = vmatmul.msk.f32.vlgmr.msra.gmra.mxu2 %vm337_vm3, %v329_v62 }
 0x24b   :  { %v406_v1 = vpop.f32.mrf.mxu2 }
 0x24c   :  { %v407_v2 = vadd.f32 %v406_v1, %v336_v0 }
 0x24e   :  { %409 = vst [vmem:[#allocation3] sm:$0x1] %v407_v2 }
 0x24f   :  { %420 = dma.vmem_to_hbm [thread:$0]  %s416_s29, 16, %s418_s6, [#allocation4]  }
 0x250   :  { %515 = dma.done.wait [#allocation4], 16  }
 0x251   :  { %516 = vsyncadd [#allocation4], 4294967280 }
 0x252   :  { %425 = vsyncpa [#allocation4], 1 }

</bundles_post_ra>
